<compile_context>
chip_gen: v7x
topology: tpu7x:2x2x1
jax: 0.10.0
libtpu: 0.0.40
codegen_flags: <defaults>
</compile_context>

<pallas_src>
import jax
import jax.numpy as jnp
from jax import lax
from jax.experimental import pallas as pl
from jax.experimental.pallas import tpu as pltpu

_LANES = 128           # vreg lane width
_PACK_W = 128          # lane-dense packed output width
_COL_VALUE = 0
_COL_UNCERTAINTY = 1
_COL_ENTROPY = 2


# ----------------------------------------------------------------------------
# Small helpers (sizing / VMEM accounting)
# ----------------------------------------------------------------------------
def _round_up(x, m):
    return ((x + m - 1) // m) * m


def _pad2d_bytes(rows, cols, itemsize):
    """VMEM footprint of a 2-D buffer after (8, 128) layout padding."""
    return _round_up(max(rows, 1), 8) * _round_up(max(cols, 1), _LANES) * itemsize


def _vmem_budget_bytes():
    """Generation-aware scoped-VMEM budget: ~75% of per-core capacity.

    Leaves headroom for compiler-internal scratch / semaphores.  Falls back to a
    conservative 48 MiB (v7x-sized) budget if the query is unavailable.
    """
    try:
        cap = int(pltpu.get_tpu_info().vmem_capacity_bytes)
    except Exception:
        cap = 64 * 2**20
    return (cap * 3) // 4


def _v_tile_candidates(V, desired):
    cands = []
    for c in (desired, 2048, 1024, 512, 256, 128):
        if 0 < c <= V and V % c == 0 and c % _LANES == 0 and c not in cands:
            cands.append(c)
    if not cands:
        cands = [V]                      # tiny / odd vocab: one full-width tile
    return cands


def _m_tile_candidates(Mr, desired):
    cap = min(Mr, max(_round_up(desired, 8), 8))
    cands = [cap]
    for c in (1024, 512, 256, 128, 64, 32, 16, 8):
        if c < cap and c not in cands:
            cands.append(c)
    return cands


def _fused_step_vmem_bytes(tm, tv, H, UHp, in_item, logit_item):
    """Padded per-grid-step VMEM use of the fused kernel (double buffers incl.)."""
    return (
        2 * _pad2d_bytes(tm, H, in_item)          # hidden tile
        + 2 * _pad2d_bytes(H, tv, in_item)        # W_lm tile
        + 2 * _pad2d_bytes(1, tv, 4)              # b_lm tile
        + 2 * _pad2d_bytes(H, UHp, in_item)       # W_small (W_u1 | w_v fold)
        + 2 * _pad2d_bytes(1, UHp, 4)             # b_small
        + 2 * _pad2d_bytes(1, UHp, 4)             # w_u2 row
        + 2 * _pad2d_bytes(1, 1, 4)               # b_u2
        + 2 * _pad2d_bytes(tm, tv, logit_item)    # logits out tile
        + 2 * _pad2d_bytes(tm, _PACK_W, 4)        # packed out tile
        + 3 * _pad2d_bytes(tm, _LANES, 4)         # m/s/t per-lane scratch
        + _pad2d_bytes(tm, tv, 4)                 # f32 logits compute temporary
        + _pad2d_bytes(tm, UHp, 4)                # small-head compute temporary
    )


# ----------------------------------------------------------------------------
# In-kernel entropy helpers (shared by both kernels)
# ----------------------------------------------------------------------------
def _online_entropy_update(x, m_sc, s_sc, t_sc):
    """Fold one [tm, tv] f32 tile into running per-lane (max, sum-exp, sum-exp*x).

    The per-lane path uses only lane-aligned 128-wide slices -> pure VPU folds
    (no XLU reductions until the single finalize).
    """
    tv = x.shape[1]
    if tv % _LANES == 0:
        nchunk = tv // _LANES
        m_old = m_sc[...]
        m_new = m_old
        for q in range(nchunk):
            m_new = jnp.maximum(m_new, x[:, q * _LANES:(q + 1) * _LANES])
        alpha = jnp.exp(m_old - m_new)
        s_acc = alpha * s_sc[...]
        t_acc = alpha * t_sc[...]
        for q in range(nchunk):
            c = x[:, q * _LANES:(q + 1) * _LANES]
            e = jnp.exp(c - m_new)
            s_acc = s_acc + e
            t_acc = t_acc + e * c
        m_sc[...] = m_new
        s_sc[...] = s_acc
        t_sc[...] = t_acc
    else:
        # General fallback (non-128-multiple width): keep stats in lane 0 only.
        m_old = m_sc[:, 0:1]
        m_new = jnp.maximum(m_old, jnp.max(x, axis=-1, keepdims=True))
        alpha = jnp.exp(m_old - m_new)
        e = jnp.exp(x - m_new)
        s_new = alpha * s_sc[:, 0:1] + jnp.sum(e, axis=-1, keepdims=True)
        t_new = alpha * t_sc[:, 0:1] + jnp.sum(e * x, axis=-1, keepdims=True)
        col = lax.broadcasted_iota(jnp.int32, m_sc.shape, 1)
        m_sc[...] = jnp.where(col == 0, m_new, -jnp.inf)
        s_sc[...] = jnp.where(col == 0, s_new, 0.0)
        t_sc[...] = jnp.where(col == 0, t_new, 0.0)


def _finalize_entropy(m_sc, s_sc, t_sc):
    """Single cross-lane combine: H = M + log(S) - T/S  ->  [tm, 1] f32."""
    m_row = jnp.max(m_sc[...], axis=-1, keepdims=True)
    w = jnp.exp(m_sc[...] - m_row)
    s_row = jnp.sum(s_sc[...] * w, axis=-1, keepdims=True)
    t_row = jnp.sum(t_sc[...] * w, axis=-1, keepdims=True)
    # Exact divide: finalize runs once per M tile, so accuracy is free here.
    return m_row + jnp.log(s_row) - t_row / s_row


# ----------------------------------------------------------------------------
# Fused heads + entropy kernel
# ----------------------------------------------------------------------------
def fused_heads_kernel(h_ref, wlm_ref, blm_ref, wsm_ref, bsm_ref, wu2_ref, bu2_ref,
                       logits_ref, packed_ref, m_sc, s_sc, t_sc):
    j = pl.program_id(1)
    nv = pl.num_programs(1)

    h = h_ref[...]                                               # [tm, H] bf16

    # ---- once per M tile: fused value + uncertainty heads (one MXU pass) ----
    @pl.when(j == 0)
    def _():
        uh = wu2_ref.shape[1]
        combo = (jnp.dot(h, wsm_ref[...], preferred_element_type=jnp.float32)
                 + bsm_ref[...])                                 # [tm, UHp] f32
        value = combo[:, uh:uh + 1]                              # h @ w_v + b_v (no ReLU)
        z = jnp.maximum(combo[:, :uh], 0.0)                      # ReLU(h @ W_u1 + b_u1)
        unc = jnp.sum(z * wu2_ref[...], axis=-1, keepdims=True) + bu2_ref[...]
        col = lax.broadcasted_iota(jnp.int32, packed_ref.shape, 1)
        packed_ref[...] = jnp.where(col == _COL_VALUE, value,
                                    jnp.where(col == _COL_UNCERTAINTY, unc, 0.0))
        # init per-lane entropy running stats
        m_sc[...] = jnp.full(m_sc.shape, -jnp.inf, m_sc.dtype)
        s_sc[...] = jnp.zeros(s_sc.shape, s_sc.dtype)
        t_sc[...] = jnp.zeros(t_sc.shape, t_sc.dtype)

    # ---- every (i, j): LM-head logits tile + per-lane online entropy update --
    logits = (jnp.dot(h, wlm_ref[...], preferred_element_type=jnp.float32)
              + blm_ref[...])                                    # [tm, tv] f32
    logits_ref[...] = logits.astype(logits_ref.dtype)
    _online_entropy_update(logits, m_sc, s_sc, t_sc)

    # ---- last V tile: one cross-lane combine, merge entropy column ----------
    @pl.when(j == nv - 1)
    def _():
        ent = _finalize_entropy(m_sc, s_sc, t_sc)                # [tm, 1]
        col = lax.broadcasted_iota(jnp.int32, packed_ref.shape, 1)
        packed_ref[...] = jnp.where(col == _COL_ENTROPY, ent, packed_ref[...])


# ----------------------------------------------------------------------------
# Standalone entropy kernel (API parity with compute_entropy_bonus(logits))
# ----------------------------------------------------------------------------
def entropy_kernel(x_ref, out_ref, m_sc, s_sc, t_sc):
    j = pl.program_id(1)
    nv = pl.num_programs(1)

    @pl.when(j == 0)
    def _():
        m_sc[...] = jnp.full(m_sc.shape, -jnp.inf, m_sc.dtype)
        s_sc[...] = jnp.zeros(s_sc.shape, s_sc.dtype)
        t_sc[...] = jnp.zeros(t_sc.shape, t_sc.dtype)

    _online_entropy_update(x_ref[...].astype(jnp.float32), m_sc, s_sc, t_sc)

    @pl.when(j == nv - 1)
    def _():
        ent = _finalize_entropy(m_sc, s_sc, t_sc)
        col = lax.broadcasted_iota(jnp.int32, out_ref.shape, 1)
        out_ref[...] = jnp.where(col == 0, ent, 0.0)


# ----------------------------------------------------------------------------
# Wrappers
# ----------------------------------------------------------------------------
def run_fused_heads(hidden2d, params, *, tm=512, tv=2048,
                    compute_dtype=jnp.bfloat16, logits_dtype=jnp.float32):
    """Returns (logits [M,V], values [M,1] f32, uncertainty [M,1] f32, entropy [M] f32)."""
    M, H = hidden2d.shape
    V = params["w_lm"].shape[1]
    UH = params["w_u1"].shape[1]
    UHp = _round_up(UH + 1, _LANES)          # [ W_u1 | w_v | zero pad ], lane aligned

    in_item = jnp.dtype(compute_dtype).itemsize
    logit_item = jnp.dtype(logits_dtype).itemsize

    # --- tile selection under a generation-aware VMEM budget ------------------
    budget = _vmem_budget_bytes()
    Mr = _round_up(M, 8)
    tv_cands = _v_tile_candidates(V, tv)
    tm_cands = _m_tile_candidates(Mr, tm)

    tm_eff, tv_eff = tm_cands[-1], tv_cands[-1]
    found = False
    for tm_c in tm_cands:                     # tm first: W_lm is re-streamed per M tile
        for tv_c in tv_cands:                 # then tv: amortize per-grid-step overhead
            if _fused_step_vmem_bytes(tm_c, tv_c, H, UHp, in_item, logit_item) <= budget:
                tm_eff, tv_eff, found = tm_c, tv_c, True
                break
        if found:
            break

    # Keep >=2 M tiles so the "parallel" axis can feed both TensorCores (v7x).
    if Mr > 8 and tm_eff >= Mr:
        tm_eff = _round_up((Mr + 1) // 2, 8)

    Mp = _round_up(M, tm_eff)
    grid = (Mp // tm_eff, V // tv_eff)

    step_bytes = _fused_step_vmem_bytes(tm_eff, tv_eff, H, UHp, in_item, logit_item)
    vmem_limit = int(max(budget, min(step_bytes + (8 << 20), 128 * 2**20)))

    # --- operand preparation ---------------------------------------------------
    h = hidden2d.astype(compute_dtype)
    if Mp != M:
        h = jnp.pad(h, ((0, Mp - M), (0, 0)))

    w_lm = params["w_lm"].astype(compute_dtype)                   # [H, V]
    b_lm = params["b_lm"].reshape(1, V).astype(jnp.float32)

    # Fold the value head into the uncertainty head's first MXU pass.
    w_small = jnp.zeros((H, UHp), jnp.float32)
    w_small = w_small.at[:, :UH].set(params["w_u1"].astype(jnp.float32))
    w_small = w_small.at[:, UH].set(params["w_v"].reshape(H).astype(jnp.float32))
    w_small = w_small.astype(compute_dtype)
    b_small = jnp.zeros((1, UHp), jnp.float32)
    b_small = b_small.at[:, :UH].set(params["b_u1"].reshape(1, UH).astype(jnp.float32))
    b_small = b_small.at[:, UH].set(params["b_v"].reshape(()).astype(jnp.float32))

    w_u2 = params["w_u2"].reshape(1, UH).astype(jnp.float32)      # row layout (VPU reduce)
    b_u2 = params["b_u2"].reshape(1, 1).astype(jnp.float32)

    num_m_tiles = Mp // tm_eff
    cost = pl.CostEstimate(
        flops=int(2 * Mp * H * V + 2 * Mp * H * UHp + 2 * Mp * UHp + 6 * Mp * V),
        transcendentals=int(Mp * V + 2 * Mp * _LANES),
        bytes_accessed=int(
            Mp * H * in_item                                   # hidden (once per M tile)
            + num_m_tiles * (H * V * in_item + V * 4)          # W_lm/b_lm re-streamed per M tile
            + H * UHp * in_item + 2 * UHp * 4 + 4              # resident small weights
            + Mp * V * logit_item + Mp * _PACK_W * 4),         # logits + packed writeback
    )

    logits, packed = pl.pallas_call(
        fused_heads_kernel,
        out_shape=(jax.ShapeDtypeStruct((Mp, V), logits_dtype),
                   jax.ShapeDtypeStruct((Mp, _PACK_W), jnp.float32)),
        grid_spec=pltpu.PrefetchScalarGridSpec(
            num_scalar_prefetch=0,
            grid=grid,
            in_specs=[
                pl.BlockSpec((tm_eff, H), lambda i, j: (i, 0)),    # hidden
                pl.BlockSpec((H, tv_eff), lambda i, j: (0, j)),    # W_lm
                pl.BlockSpec((1, tv_eff), lambda i, j: (0, j)),    # b_lm
                pl.BlockSpec((H, UHp),    lambda i, j: (0, 0)),    # W_small (W_u1|w_v)
                pl.BlockSpec((1, UHp),    lambda i, j: (0, 0)),    # b_small
                pl.BlockSpec((1, UH),     lambda i, j: (0, 0)),    # w_u2 row
                pl.BlockSpec((1, 1),      lambda i, j: (0, 0)),    # b_u2
            ],
            out_specs=(
                pl.BlockSpec((tm_eff, tv_eff), lambda i, j: (i, j)),   # logits
                pl.BlockSpec((tm_eff, _PACK_W), lambda i, j: (i, 0)),  # packed small outs
            ),
            scratch_shapes=[pltpu.VMEM((tm_eff, _LANES), jnp.float32)] * 3,
        ),
        compiler_params=pltpu.CompilerParams(
            dimension_semantics=("parallel", "arbitrary"),
            vmem_limit_bytes=vmem_limit,
        ),
        cost_estimate=cost,
    )(h, w_lm, b_lm, w_small, b_small, w_u2, b_u2)

    logits = logits[:M]
    values = packed[:M, _COL_VALUE:_COL_VALUE + 1]
    uncertainty = packed[:M, _COL_UNCERTAINTY:_COL_UNCERTAINTY + 1]
    entropy = packed[:M, _COL_ENTROPY]
    return logits, values, uncertainty, entropy


def information_exploration_forward(input_ids, params, *, tm=512, tv=2048,
                                    logits_dtype=jnp.float32):
    """Mirrors InformationExplorationModel.forward.

    Returns (outputs_dict, entropy_bonus): the dict has the module's 4 keys; the
    entropy bonus comes for free from the fused kernel (no logits HBM round-trip).
    """
    B, S = input_ids.shape
    H = params["embed"].shape[1]
    V = params["w_lm"].shape[1]
    M = B * S

    # TODO(synk): real HF base_model stack is external; stood in by an embedding lookup.
    hidden_states = params["embed"][input_ids]                  # [B, S, H] f32
    hidden2d = hidden_states.reshape(M, H)

    logits2d, values2d, unc2d, ent1d = run_fused_heads(
        hidden2d, params, tm=tm, tv=tv, logits_dtype=logits_dtype)

    outputs = {
        "logits": logits2d.reshape(B, S, V),
        "values": values2d.reshape(B, S, 1),
        "hidden_states": hidden_states,
        "uncertainty": unc2d.reshape(B, S, 1),
    }
    return outputs, ent1d.reshape(B, S)


def compute_entropy_bonus(logits, *, tm=512, tv=2048):
    """Standalone entropy bonus on arbitrary logits (module API parity)."""
    B, S, V = logits.shape
    M = B * S
    x = logits.reshape(M, V).astype(jnp.float32)

    budget = _vmem_budget_bytes()
    Mr = _round_up(M, 8)
    tv_cands = _v_tile_candidates(V, tv)
    tm_cands = _m_tile_candidates(Mr, tm)

    def step_bytes(tm_c, tv_c):
        return (2 * _pad2d_bytes(tm_c, tv_c, 4)
                + 2 * _pad2d_bytes(tm_c, _PACK_W, 4)
                + 3 * _pad2d_bytes(tm_c, _LANES, 4)
                + _pad2d_bytes(tm_c, tv_c, 4))

    tm_eff, tv_eff = tm_cands[-1], tv_cands[-1]
    found = False
    for tm_c in tm_cands:
        for tv_c in tv_cands:
            if step_bytes(tm_c, tv_c) <= budget:
                tm_eff, tv_eff, found = tm_c, tv_c, True
                break
        if found:
            break

    Mp = _round_up(M, tm_eff)
    if Mp != M:
        x = jnp.pad(x, ((0, Mp - M), (0, 0)))

    vmem_limit = int(max(budget, min(step_bytes(tm_eff, tv_eff) + (4 << 20), 128 * 2**20)))

    packed = pl.pallas_call(
        entropy_kernel,
        out_shape=jax.ShapeDtypeStruct((Mp, _PACK_W), jnp.float32),
        grid_spec=pltpu.PrefetchScalarGridSpec(
            num_scalar_prefetch=0,
            grid=(Mp // tm_eff, V // tv_eff),
            in_specs=[pl.BlockSpec((tm_eff, tv_eff), lambda i, j: (i, j))],
            out_specs=pl.BlockSpec((tm_eff, _PACK_W), lambda i, j: (i, 0)),
            scratch_shapes=[pltpu.VMEM((tm_eff, _LANES), jnp.float32)] * 3,
        ),
        compiler_params=pltpu.CompilerParams(
            dimension_semantics=("parallel", "arbitrary"),
            vmem_limit_bytes=vmem_limit,
        ),
        cost_estimate=pl.CostEstimate(
            flops=int(6 * Mp * V),
            transcendentals=int(Mp * V + Mp * _LANES),
            bytes_accessed=int(Mp * V * 4 + Mp * _PACK_W * 4),
        ),
    )(x)
    return packed[:M, 0].reshape(B, S)


# ----------------------------------------------------------------------------
# Deterministic parameter construction
# ----------------------------------------------------------------------------
def make_params(key, vocab, hidden, u_hidden=128):
    ks = jax.random.split(key, 5)
    scale_h = 1.0 / jnp.sqrt(hidden)
    scale_u = 1.0 / jnp.sqrt(u_hidden)
    return {
        "embed": jax.random.normal(ks[0], (vocab, hidden), jnp.float32) * 0.02,
        "w_lm":  jax.random.normal(ks[1], (hidden, vocab), jnp.float32) * scale_h,
        "b_lm":  jnp.zeros((1, vocab), jnp.float32),
        "w_v":   jax.random.normal(ks[2], (hidden, 1), jnp.float32) * scale_h,
        "b_v":   jnp.zeros((1, 1), jnp.float32),
        "w_u1":  jax.random.normal(ks[3], (hidden, u_hidden), jnp.float32) * scale_h,
        "b_u1":  jnp.zeros((1, u_hidden), jnp.float32),
        "w_u2":  jax.random.normal(ks[4], (u_hidden, 1), jnp.float32) * scale_u,
        "b_u2":  jnp.zeros((1, 1), jnp.float32),
    }


if __name__ == "__main__":
    B, S, H, V = 2, 8, 32, 128

    key = jax.random.PRNGKey(0)
    k_param, k_ids = jax.random.split(key)
    params = make_params(k_param, vocab=V, hidden=H)
    input_ids = jax.random.randint(k_ids, (B, S), 0, V, dtype=jnp.int32)

    out, entropy_fused = information_exploration_forward(input_ids, params)
    entropy_standalone = compute_entropy_bonus(out["logits"])
    jax.block_until_ready((out, entropy_fused, entropy_standalone))

    # shape checks
    assert out["logits"].shape == (B, S, V)
    assert out["values"].shape == (B, S, 1)
    assert out["uncertainty"].shape == (B, S, 1)
    assert out["hidden_states"].shape == (B, S, H)
    assert entropy_fused.shape == (B, S)
    assert entropy_standalone.shape == (B, S)

    # pure-JAX reference on the same bf16-cast operands the kernel consumes
    M = B * S
    hf = params["embed"][input_ids].reshape(M, H).astype(jnp.bfloat16).astype(jnp.float32)
    wlm_f = params["w_lm"].astype(jnp.bfloat16).astype(jnp.float32)
    wv_f = params["w_v"].astype(jnp.bfloat16).astype(jnp.float32)
    wu1_f = params["w_u1"].astype(jnp.bfloat16).astype(jnp.float32)
    ref_logits = hf @ wlm_f + params["b_lm"]
    ref_values = hf @ wv_f + params["b_v"]
    ref_z = jnp.maximum(hf @ wu1_f + params["b_u1"], 0.0)
    ref_unc = ref_z @ params["w_u2"] + params["b_u2"]
    p = jax.nn.softmax(ref_logits, axis=-1)
    lp = jax.nn.log_softmax(ref_logits, axis=-1)
    ref_ent = -(p * lp).sum(-1)

    assert jnp.allclose(out["logits"].reshape(M, V).astype(jnp.float32), ref_logits,
                        atol=3e-2, rtol=3e-2)
    assert jnp.allclose(out["values"].reshape(M, 1), ref_values, atol=3e-2, rtol=3e-2)
    assert jnp.allclose(out["uncertainty"].reshape(M, 1), ref_unc, atol=3e-2, rtol=3e-2)
    assert jnp.allclose(entropy_fused.reshape(M), ref_ent, atol=3e-2, rtol=3e-2)
    assert jnp.allclose(entropy_standalone.reshape(M), ref_ent, atol=3e-2, rtol=3e-2)

    print("KERNEL_OK")
</pallas_src>

<mosaic_0001>
module attributes {stable_mosaic.version = 11 : i64} {
  func.func @fused_heads_kernel(%arg0: i32, %arg1: i32, %arg2: memref<8x32xbf16, #tpu.memory_space<vmem>>, %arg3: memref<32x128xbf16, #tpu.memory_space<vmem>>, %arg4: memref<1x128xf32, #tpu.memory_space<vmem>>, %arg5: memref<32x256xbf16, #tpu.memory_space<vmem>>, %arg6: memref<1x256xf32, #tpu.memory_space<vmem>>, %arg7: memref<1x128xf32, #tpu.memory_space<vmem>>, %arg8: memref<1x1xf32, #tpu.memory_space<vmem>>, %arg9: memref<8x128xf32, #tpu.memory_space<vmem>>, %arg10: memref<8x128xf32, #tpu.memory_space<vmem>>, %arg11: memref<8x128xf32, #tpu.memory_space<vmem>>, %arg12: memref<8x128xf32, #tpu.memory_space<vmem>>, %arg13: memref<8x128xf32, #tpu.memory_space<vmem>>) attributes {dimension_semantics = [#tpu.dimension_semantics<parallel>, #tpu.dimension_semantics<arbitrary>], iteration_bounds = array<i64: 2, 1>, scalar_prefetch = 0 : i64, scratch_operands = 3 : i64, tpu.core_type = #tpu.core_type<tc>, window_params = [{transform_indices = @transform_0, window_bounds = array<i64: 8, 32>}, {transform_indices = @transform_1, window_bounds = array<i64: 32, 128>}, {transform_indices = @transform_2, window_bounds = array<i64: 1, 128>}, {pipeline_mode = #tpu.pipeline_mode<synchronous>, transform_indices = @transform_3, window_bounds = array<i64: 32, 256>}, {pipeline_mode = #tpu.pipeline_mode<synchronous>, transform_indices = @transform_4, window_bounds = array<i64: 1, 256>}, {pipeline_mode = #tpu.pipeline_mode<synchronous>, transform_indices = @transform_5, window_bounds = array<i64: 1, 128>}, {pipeline_mode = #tpu.pipeline_mode<synchronous>, transform_indices = @transform_6, window_bounds = array<i64: 1, 1>}, {transform_indices = @transform_7, window_bounds = array<i64: 8, 128>}, {transform_indices = @transform_8, window_bounds = array<i64: 8, 128>}]} {
    %c0 = arith.constant 0 : index
    %c0_0 = arith.constant 0 : index
    %0 = vector.load %arg2[%c0, %c0_0] : memref<8x32xbf16, #tpu.memory_space<vmem>>, vector<8x32xbf16>
    %c0_i32 = arith.constant 0 : i32
    %1 = arith.cmpi eq, %arg1, %c0_i32 : i32
    %2 = arith.extui %1 : i1 to i32
    %c0_i32_1 = arith.constant 0 : i32
    %3 = arith.cmpi ne, %2, %c0_i32_1 : i32
    scf.if %3 {
      %c0_22 = arith.constant 0 : index
      %c0_23 = arith.constant 0 : index
      %29 = vector.load %arg5[%c0_22, %c0_23] : memref<32x256xbf16, #tpu.memory_space<vmem>>, vector<32x256xbf16>
      %cst_24 = arith.constant dense<0.000000e+00> : vector<8x256xf32>
      %30 = tpu.matmul %0, %29, %cst_24 {dimension_numbers = #tpu.dot_dimension_numbers<[1], [0], [0], [1], [0, 0, 1, 1], [], []>} : vector<8x32xbf16>, vector<32x256xbf16>, vector<8x256xf32> -> vector<8x256xf32>
      %c0_25 = arith.constant 0 : index
      %c0_26 = arith.constant 0 : index
      %31 = vector.load %arg6[%c0_25, %c0_26] : memref<1x256xf32, #tpu.memory_space<vmem>>, vector<1x256xf32>
      %32 = vector.broadcast %31 : vector<1x256xf32> to vector<8x256xf32>
      %33 = arith.addf %30, %32 : vector<8x256xf32>
      %34 = vector.extract_strided_slice %33 {offsets = [0, 128], sizes = [8, 1], strides = [1, 1]} : vector<8x256xf32> to vector<8x1xf32>
      %35 = vector.extract_strided_slice %33 {offsets = [0, 0], sizes = [8, 128], strides = [1, 1]} : vector<8x256xf32> to vector<8x128xf32>
      %cst_27 = arith.constant 0.000000e+00 : f32
      %36 = vector.broadcast %cst_27 : f32 to vector<8x128xf32>
      %37 = arith.maximumf %35, %36 : vector<8x128xf32>
      %c0_28 = arith.constant 0 : index
      %c0_29 = arith.constant 0 : index
      %38 = vector.load %arg7[%c0_28, %c0_29] : memref<1x128xf32, #tpu.memory_space<vmem>>, vector<1x128xf32>
      %39 = vector.broadcast %38 : vector<1x128xf32> to vector<8x128xf32>
      %40 = arith.mulf %37, %39 : vector<8x128xf32>
      %cst_30 = arith.constant dense<0.000000e+00> : vector<8xf32>
      %41 = vector.multi_reduction <add>, %40, %cst_30 [1] : vector<8x128xf32> to vector<8xf32>
      %42 = vector.shape_cast %41 : vector<8xf32> to vector<8x1xf32>
      %c0_31 = arith.constant 0 : index
      %c0_32 = arith.constant 0 : index
      %43 = vector.load %arg8[%c0_31, %c0_32] : memref<1x1xf32, #tpu.memory_space<vmem>>, vector<1x1xf32>
      %44 = vector.broadcast %43 : vector<1x1xf32> to vector<8x1xf32>
      %45 = arith.addf %42, %44 : vector<8x1xf32>
      %46 = tpu.iota {dimensions = array<i32: 1>} : vector<8x128xi32>
      %c0_i32_33 = arith.constant 0 : i32
      %47 = vector.broadcast %c0_i32_33 : i32 to vector<8x128xi32>
      %48 = arith.cmpi eq, %46, %47 : vector<8x128xi32>
      %c1_i32 = arith.constant 1 : i32
      %49 = vector.broadcast %c1_i32 : i32 to vector<8x128xi32>
      %50 = arith.cmpi eq, %46, %49 : vector<8x128xi32>
      %cst_34 = arith.constant 0.000000e+00 : f32
      %51 = vector.shape_cast %45 : vector<8x1xf32> to vector<8x1xf32>
      %52 = vector.broadcast %51 : vector<8x1xf32> to vector<8x128xf32>
      %53 = vector.broadcast %cst_34 : f32 to vector<8x128xf32>
      %54 = arith.select %50, %52, %53 : vector<8x128xi1>, vector<8x128xf32>
      %55 = vector.shape_cast %34 : vector<8x1xf32> to vector<8x1xf32>
      %56 = vector.broadcast %55 : vector<8x1xf32> to vector<8x128xf32>
      %57 = arith.select %48, %56, %54 : vector<8x128xi1>, vector<8x128xf32>
      %c0_35 = arith.constant 0 : index
      %c0_36 = arith.constant 0 : index
      %58 = vector.load %arg10[%c0_35, %c0_36] : memref<8x128xf32, #tpu.memory_space<vmem>>, vector<8x128xf32>
      tpu.vector_store %arg10[%c0_35, %c0_36], %57 {strides = array<i32>} : memref<8x128xf32, #tpu.memory_space<vmem>>, vector<8x128xf32>,
      %cst_37 = arith.constant 0xFF800000 : f32
      %59 = vector.broadcast %cst_37 : f32 to vector<8x128xf32>
      %c0_38 = arith.constant 0 : index
      %c0_39 = arith.constant 0 : index
      %60 = vector.load %arg11[%c0_38, %c0_39] : memref<8x128xf32, #tpu.memory_space<vmem>>, vector<8x128xf32>
      tpu.vector_store %arg11[%c0_38, %c0_39], %59 {strides = array<i32>} : memref<8x128xf32, #tpu.memory_space<vmem>>, vector<8x128xf32>,
      %cst_40 = arith.constant 0.000000e+00 : f32
      %61 = vector.broadcast %cst_40 : f32 to vector<8x128xf32>
      %c0_41 = arith.constant 0 : index
      %c0_42 = arith.constant 0 : index
      %62 = vector.load %arg12[%c0_41, %c0_42] : memref<8x128xf32, #tpu.memory_space<vmem>>, vector<8x128xf32>
      tpu.vector_store %arg12[%c0_41, %c0_42], %61 {strides = array<i32>} : memref<8x128xf32, #tpu.memory_space<vmem>>, vector<8x128xf32>,
      %cst_43 = arith.constant 0.000000e+00 : f32
      %63 = vector.broadcast %cst_43 : f32 to vector<8x128xf32>
      %c0_44 = arith.constant 0 : index
      %c0_45 = arith.constant 0 : index
      %64 = vector.load %arg13[%c0_44, %c0_45] : memref<8x128xf32, #tpu.memory_space<vmem>>, vector<8x128xf32>
      tpu.vector_store %arg13[%c0_44, %c0_45], %63 {strides = array<i32>} : memref<8x128xf32, #tpu.memory_space<vmem>>, vector<8x128xf32>,
    } else {
    }
    %c0_2 = arith.constant 0 : index
    %c0_3 = arith.constant 0 : index
    %4 = vector.load %arg3[%c0_2, %c0_3] : memref<32x128xbf16, #tpu.memory_space<vmem>>, vector<32x128xbf16>
    %cst = arith.constant dense<0.000000e+00> : vector<8x128xf32>
    %5 = tpu.matmul %0, %4, %cst {dimension_numbers = #tpu.dot_dimension_numbers<[1], [0], [0], [1], [0, 0, 1, 1], [], []>} : vector<8x32xbf16>, vector<32x128xbf16>, vector<8x128xf32> -> vector<8x128xf32>
    %c0_4 = arith.constant 0 : index
    %c0_5 = arith.constant 0 : index
    %6 = vector.load %arg4[%c0_4, %c0_5] : memref<1x128xf32, #tpu.memory_space<vmem>>, vector<1x128xf32>
    %7 = vector.broadcast %6 : vector<1x128xf32> to vector<8x128xf32>
    %8 = arith.addf %5, %7 : vector<8x128xf32>
    %c0_6 = arith.constant 0 : index
    %c0_7 = arith.constant 0 : index
    %9 = vector.load %arg9[%c0_6, %c0_7] : memref<8x128xf32, #tpu.memory_space<vmem>>, vector<8x128xf32>
    tpu.vector_store %arg9[%c0_6, %c0_7], %8 {strides = array<i32>} : memref<8x128xf32, #tpu.memory_space<vmem>>, vector<8x128xf32>,
    %c0_8 = arith.constant 0 : index
    %c0_9 = arith.constant 0 : index
    %10 = vector.load %arg11[%c0_8, %c0_9] : memref<8x128xf32, #tpu.memory_space<vmem>>, vector<8x128xf32>
    %11 = arith.maximumf %10, %8 : vector<8x128xf32>
    %12 = arith.subf %10, %11 : vector<8x128xf32>
    %13 = math.exp %12 : vector<8x128xf32>
    %c0_10 = arith.constant 0 : index
    %c0_11 = arith.constant 0 : index
    %14 = vector.load %arg12[%c0_10, %c0_11] : memref<8x128xf32, #tpu.memory_space<vmem>>, vector<8x128xf32>
    %15 = arith.mulf %13, %14 : vector<8x128xf32>
    %c0_12 = arith.constant 0 : index
    %c0_13 = arith.constant 0 : index
    %16 = vector.load %arg13[%c0_12, %c0_13] : memref<8x128xf32, #tpu.memory_space<vmem>>, vector<8x128xf32>
    %17 = arith.mulf %13, %16 : vector<8x128xf32>
    %18 = arith.subf %8, %11 : vector<8x128xf32>
    %19 = math.exp %18 : vector<8x128xf32>
    %20 = arith.addf %15, %19 : vector<8x128xf32>
    %21 = arith.mulf %19, %8 : vector<8x128xf32>
    %22 = arith.addf %17, %21 : vector<8x128xf32>
    %c0_14 = arith.constant 0 : index
    %c0_15 = arith.constant 0 : index
    %23 = vector.load %arg11[%c0_14, %c0_15] : memref<8x128xf32, #tpu.memory_space<vmem>>, vector<8x128xf32>
    tpu.vector_store %arg11[%c0_14, %c0_15], %11 {strides = array<i32>} : memref<8x128xf32, #tpu.memory_space<vmem>>, vector<8x128xf32>,
    %c0_16 = arith.constant 0 : index
    %c0_17 = arith.constant 0 : index
    %24 = vector.load %arg12[%c0_16, %c0_17] : memref<8x128xf32, #tpu.memory_space<vmem>>, vector<8x128xf32>
    tpu.vector_store %arg12[%c0_16, %c0_17], %20 {strides = array<i32>} : memref<8x128xf32, #tpu.memory_space<vmem>>, vector<8x128xf32>,
    %c0_18 = arith.constant 0 : index
    %c0_19 = arith.constant 0 : index
    %25 = vector.load %arg13[%c0_18, %c0_19] : memref<8x128xf32, #tpu.memory_space<vmem>>, vector<8x128xf32>
    tpu.vector_store %arg13[%c0_18, %c0_19], %22 {strides = array<i32>} : memref<8x128xf32, #tpu.memory_space<vmem>>, vector<8x128xf32>,
    %c0_i32_20 = arith.constant 0 : i32
    %26 = arith.cmpi eq, %arg1, %c0_i32_20 : i32
    %27 = arith.extui %26 : i1 to i32
    %c0_i32_21 = arith.constant 0 : i32
    %28 = arith.cmpi ne, %27, %c0_i32_21 : i32
    scf.if %28 {
      %c0_22 = arith.constant 0 : index
      %c0_23 = arith.constant 0 : index
      %29 = vector.load %arg11[%c0_22, %c0_23] : memref<8x128xf32, #tpu.memory_space<vmem>>, vector<8x128xf32>
      %cst_24 = arith.constant dense<0xFF800000> : vector<8xf32>
      %30 = vector.multi_reduction <maximumf>, %29, %cst_24 [1] : vector<8x128xf32> to vector<8xf32>
      %31 = vector.shape_cast %30 : vector<8xf32> to vector<8x1xf32>
      %c0_25 = arith.constant 0 : index
      %c0_26 = arith.constant 0 : index
      %32 = vector.load %arg11[%c0_25, %c0_26] : memref<8x128xf32, #tpu.memory_space<vmem>>, vector<8x128xf32>
      %33 = vector.broadcast %31 : vector<8x1xf32> to vector<8x128xf32>
      %34 = arith.subf %32, %33 : vector<8x128xf32>
      %35 = math.exp %34 : vector<8x128xf32>
      %c0_27 = arith.constant 0 : index
      %c0_28 = arith.constant 0 : index
      %36 = vector.load %arg12[%c0_27, %c0_28] : memref<8x128xf32, #tpu.memory_space<vmem>>, vector<8x128xf32>
      %37 = arith.mulf %36, %35 : vector<8x128xf32>
      %cst_29 = arith.constant dense<0.000000e+00> : vector<8xf32>
      %38 = vector.multi_reduction <add>, %37, %cst_29 [1] : vector<8x128xf32> to vector<8xf32>
      %39 = vector.shape_cast %38 : vector<8xf32> to vector<8x1xf32>
      %c0_30 = arith.constant 0 : index
      %c0_31 = arith.constant 0 : index
      %40 = vector.load %arg13[%c0_30, %c0_31] : memref<8x128xf32, #tpu.memory_space<vmem>>, vector<8x128xf32>
      %41 = arith.mulf %40, %35 : vector<8x128xf32>
      %cst_32 = arith.constant dense<0.000000e+00> : vector<8xf32>
      %42 = vector.multi_reduction <add>, %41, %cst_32 [1] : vector<8x128xf32> to vector<8xf32>
      %43 = vector.shape_cast %42 : vector<8xf32> to vector<8x1xf32>
      %44 = math.log %39 : vector<8x1xf32>
      %45 = arith.addf %31, %44 : vector<8x1xf32>
      %46 = arith.divf %43, %39 : vector<8x1xf32>
      %47 = arith.subf %45, %46 : vector<8x1xf32>
      %48 = tpu.iota {dimensions = array<i32: 1>} : vector<8x128xi32>
      %c2_i32 = arith.constant 2 : i32
      %49 = vector.broadcast %c2_i32 : i32 to vector<8x128xi32>
      %50 = arith.cmpi eq, %48, %49 : vector<8x128xi32>
      %c0_33 = arith.constant 0 : index
      %c0_34 = arith.constant 0 : index
      %51 = vector.load %arg10[%c0_33, %c0_34] : memref<8x128xf32, #tpu.memory_space<vmem>>, vector<8x128xf32>
      %52 = vector.shape_cast %47 : vector<8x1xf32> to vector<8x1xf32>
      %53 = vector.broadcast %52 : vector<8x1xf32> to vector<8x128xf32>
      %54 = arith.select %50, %53, %51 : vector<8x128xi1>, vector<8x128xf32>
      %c0_35 = arith.constant 0 : index
      %c0_36 = arith.constant 0 : index
      %55 = vector.load %arg10[%c0_35, %c0_36] : memref<8x128xf32, #tpu.memory_space<vmem>>, vector<8x128xf32>
      tpu.vector_store %arg10[%c0_35, %c0_36], %54 {strides = array<i32>} : memref<8x128xf32, #tpu.memory_space<vmem>>, vector<8x128xf32>,
    } else {
    }
    return
  }
  func.func @transform_0(%arg0: i32, %arg1: i32) -> (i32, i32) {
    %c0_i32 = arith.constant 0 : i32
    %c0_i32_0 = arith.constant 0 : i32
    return %arg0, %c0_i32 : i32, i32
  }
  func.func @transform_1(%arg0: i32, %arg1: i32) -> (i32, i32) {
    %c0_i32 = arith.constant 0 : i32
    %c0_i32_0 = arith.constant 0 : i32
    return %c0_i32, %arg1 : i32, i32
  }
  func.func @transform_2(%arg0: i32, %arg1: i32) -> (i32, i32) {
    %c0_i32 = arith.constant 0 : i32
    %c0_i32_0 = arith.constant 0 : i32
    return %c0_i32, %arg1 : i32, i32
  }
  func.func @transform_3(%arg0: i32, %arg1: i32) -> (i32, i32) {
    %c0_i32 = arith.constant 0 : i32
    %c0_i32_0 = arith.constant 0 : i32
    %c0_i32_1 = arith.constant 0 : i32
    return %c0_i32, %c0_i32_0 : i32, i32
  }
  func.func @transform_4(%arg0: i32, %arg1: i32) -> (i32, i32) {
    %c0_i32 = arith.constant 0 : i32
    %c0_i32_0 = arith.constant 0 : i32
    %c0_i32_1 = arith.constant 0 : i32
    return %c0_i32, %c0_i32_0 : i32, i32
  }
  func.func @transform_5(%arg0: i32, %arg1: i32) -> (i32, i32) {
    %c0_i32 = arith.constant 0 : i32
    %c0_i32_0 = arith.constant 0 : i32
    %c0_i32_1 = arith.constant 0 : i32
    return %c0_i32, %c0_i32_0 : i32, i32
  }
  func.func @transform_6(%arg0: i32, %arg1: i32) -> (i32, i32) {
    %c0_i32 = arith.constant 0 : i32
    %c0_i32_0 = arith.constant 0 : i32
    %c0_i32_1 = arith.constant 0 : i32
    return %c0_i32, %c0_i32_0 : i32, i32
  }
  func.func @transform_7(%arg0: i32, %arg1: i32) -> (i32, i32) {
    %c0_i32 = arith.constant 0 : i32
    return %arg0, %arg1 : i32, i32
  }
  func.func @transform_8(%arg0: i32, %arg1: i32) -> (i32, i32) {
    %c0_i32 = arith.constant 0 : i32
    %c0_i32_0 = arith.constant 0 : i32
    return %arg0, %c0_i32 : i32, i32
  }
}

</mosaic_0001>

<bundles_post_ra>
// kernel: tpu_custom_call.1
= control target key start
LH: loop header
LB: loop body
LE: loop exit
PB: predicated region body
PF: predicated region fallthrough
CT: control target
= control target key end

     0   :  { %s1537_s0 = inlined_call_operand.hbm [shape: bf16[16,32], index: 0, kind: input, shape index: {}]   ;;  %s1538_s1 = inlined_call_operand.hbm [shape: bf16[32,128], index: 1, kind: input, shape index: {}]   ;;  %s1539_s2 = inlined_call_operand.vmem [shape: f32[1,128], index: 2, kind: input, shape index: {}]   ;;  %s1540_s3 = inlined_call_operand.hbm [shape: bf16[32,256], index: 3, kind: input, shape index: {}]   ;;  %s1541_s4 = inlined_call_operand.vmem [shape: f32[1,256], index: 4, kind: input, shape index: {}]   ;;  %s1542_s5 = inlined_call_operand.vmem [shape: f32[1,128], index: 5, kind: input, shape index: {}]   ;;  %s1543_s6 = inlined_call_operand.<no memory space> [shape: f32[1,1], index: 6, kind: input, shape index: {}]   ;;  %s1544_s7 = inlined_call_operand.hbm [shape: f32[16,128], index: 7, kind: output, shape index: {0}]   ;;  %s1545_s8 = inlined_call_operand.hbm [shape: f32[16,128], index: 8, kind: output, shape index: {1}]  }
   0x1   :  { %v14_v0 = vstv %s1543_s6 }
   0x2   :  { %15 = vst [vmem:[#allocation5] sm:$0x1] %v14_v0 }
   0x3   :  { %16 = vsyncpa [#allocation7], 0 }
   0x4   :  { %18 = vsyncpa [#allocation7 + $0x1], 0 }
   0x5   :  { %19 = vsyncpa [#allocation10], 0 }
   0x6   :  { %20 = vsyncpa [#allocation8], 0 }
   0x7   :  { %22 = vsyncpa [#allocation8 + $0x1], 0 }
   0x8   :  { %23 = vsyncpa [#allocation14], 0 }
   0x9   :  { %25 = vsyncpa [#allocation14 + $0x1], 0  ;;  %s1240_s29 = smov 0   ;;  %s1242_s30 = smov 0  }
   0xa   :  { %s1244_s9 = smov 0   ;;  %s1246_s10 = smov 0  }
   0xb   :  { %s1248_s11 = smov 0   ;;  %s1250_s12 = smov 0  }
   0xc LB: > { %1552 = sst [smem:[#allocation19_spill]] %s1158_s29  ;;  %s816_s6 = sadd.s32 4294967295, %s1178_s12   ;;  %s1178_s12 = sphi %s1250_s12, %s31_s12   ;;  %s1174_s11 = sphi %s1248_s11, %s1573_s11   ;;  %s1170_s10 = sphi %s1246_s10, %s1572_s10   ;;  %s1166_s9 = sphi %s1244_s9, %s1571_s9   ;;  %s1162_s30 = sphi %s1242_s30, %s1570_s30   ;;  %s1158_s29 = sphi %s1240_s29, %s1569_s29  }
   0xd   : > { %s817_s13 = sadd.s32 4294967294, %s1178_s12   ;;  %p63_p0 = scmp.ne.s32.totalorder %s1162_s30, %s1158_s29 }
   0xe   : > { %p1274_p1 = scmp.eq.s32.totalorder %s816_s6, 0  ;;  %p1278_p2 = scmp.eq.s32.totalorder %s816_s6, 1 }
   0xf   : > { %p231_p3 = scmp.eq.s32.totalorder %s817_s13, 1  ;;  %p818_p5 = scmp.ge.s32.totalorder %s1178_s12, 1 }
  0x10   : > { %s1553_s14 = scalar_select %p1274_p1, 1, 0 }
  0x11   : > { %p1284_p4 = por %p1274_p1, %p63_p0  ;;  %p1289_p6 = por %p231_p3, %p63_p0 }
  0x12   : > { %p264_p7 = scmp.lt.s32.totalorder %s1178_s12, 3  ;;  %s1180_s19 = smov [#allocation9]  }
  0x13   : > { %s1555_s16 = scalar_select %p1284_p4, 1, 0 }
  0x14   : > { %s1556_s17 = scalar_select %p1289_p6, 1, 0 }
  0x15   : > { %p1294_p8 = pnand %p818_p5, %p264_p7  ;;  %s278_s20 = sshll.u32 %s1180_s19, 4  ;;  %s1298_s20 = int_to_ptr.vmem [resolvable:$true] %s278_s20 }
  0x16   : > { %1557 = sst [smem:[#allocation20_spill]] %s1556_s17  ;;  %s1181_s22 = smov [#allocation11]  }
  0x17   : > { %p873_p9 = pneg %p1294_p8  ;;  %s297_s23 = sshll.u32 %s1181_s22, 4  ;;  %s1309_s23 = int_to_ptr.vmem [resolvable:$true] %s297_s23 }
  0x18   : > { %s974_s26 = scalar_lea.hbm %s1538_s1, 256 }
  0x19   : > { %p1305_p11 = pnand %p873_p9, %p1274_p1  ;;  %p975_p12 = scmp.ne.s32.totalorder %s1538_s1, %s974_s26 }
  0x1a   : > { %p981_p5 = scmp.lt.u32.totalorder %s974_s26, %s1538_s1 }
  0x1b   : > { %p976_p13 = pneg %p1305_p11 }
  0x1d   : > { %p977_p0 = pnand %p976_p13, %p975_p12 }
  0x1f   : > { %p978_p3 = pneg %p977_p0 }
  0x21   : > { %p983_p7 = pnand %p981_p5, %p978_p3 }
  0x23   : > { %986 = shalt.err (!%p983_p7)
}
  0x24   : > { %s987_s19 = scalar_lea.vmem %s1298_s20, 256  ;;  %p995_p1 = scmp.lt.s32.totalorder %s1298_s20, %s1298_s20 }
  0x25   : > { %p988_p9 = scmp.ne.s32.totalorder %s1298_s20, %s987_s19  ;;  %p996_p12 = scmp.lt.s32.totalorder %s987_s19, %s987_s19 }
  0x27   : > { %p990_p10 = pnand %p988_p9, %p976_p13  ;;  %p997_p0 = por %p996_p12, %p995_p1 }
  0x29   : > { %p991_p6 = pneg %p990_p10 }
  0x2b   : > { %p998_p4 = pnand %p997_p0, %p991_p6 }
  0x2d   : > { %1001 = shalt.err (!%p998_p4)
}
  0x2e   : > { %s1182_s22 = smov 64   ;;  %s1183_s24 = smov 4  }
  0x2f   : > { %876 = dma.hbm_to_vmem [thread:$0]  (!%p1305_p11), %s1538_s1, 256, %s1298_s20, [#allocation10], %s1182_s22, %s1182_s22, %s1183_s24  }
  0x30   : > { %s1002_s6 = scalar_lea.hbm %s1540_s3, 512 }
  0x31   : > { %p1003_p1 = scmp.ne.s32.totalorder %s1540_s3, %s1002_s6  ;;  %p1009_p10 = scmp.lt.u32.totalorder %s1002_s6, %s1540_s3 }
  0x33   : > { %p1005_p4 = pnand %p1003_p1, %p976_p13 }
  0x35   : > { %p1006_p6 = pneg %p1005_p4 }
  0x37   : > { %p1011_p3 = pnand %p1009_p10, %p1006_p6 }
  0x39   : > { %1014 = shalt.err (!%p1011_p3)
}
  0x3a   : > { %s1015_s20 = scalar_lea.vmem %s1309_s23, 512  ;;  %p1023_p12 = scmp.lt.s32.totalorder %s1309_s23, %s1309_s23 }
  0x3b   : > { %p1016_p5 = scmp.ne.s32.totalorder %s1309_s23, %s1015_s20  ;;  %p1024_p0 = scmp.lt.s32.totalorder %s1015_s20, %s1015_s20 }
  0x3d   : > { %p1018_p7 = pnand %p1016_p5, %p976_p13  ;;  %p1025_p1 = por %p1024_p0, %p1023_p12 }
  0x3f   : > { %p1019_p9 = pneg %p1018_p7 }
  0x41   : > { %p1026_p4 = pnand %p1025_p1, %p1019_p9 }
  0x43   : > { %1029 = shalt.err (!%p1026_p4)
}
  0x44   : > { %s1184_s29 = smov 128   ;;  %s1185_s17 = smov 8  }
  0x45   : > { %879 = dma.hbm_to_vmem [thread:$0]  (!%p1305_p11), %s1540_s3, 512, %s1309_s23, [#allocation10], %s1184_s29, %s1184_s29, %s1185_s17  }
  0x46   : > { %s43_s25 = sadd.s32 1, %s1174_s11  ;;  %s50_s26 = sadd.s32 1, %s1166_s9 }
  0x47   : > { %p45_p13 = scmp.ge.s32.totalorder %s43_s25, 2  ;;  %p57_p6 = scmp.ne.s32.totalorder %s1166_s9, %s1162_s30 }
  0x48   : > { %p58_p10 = scmp.eq.s32.totalorder %s1178_s12, 0  ;;  %p893_p3 = scmp.lt.s32.totalorder %s1178_s12, 2 }
  0x49   : > { %s1575_s25 = smov (%p45_p13, %s43_s25), 0  ;;  %p1373_p7 = por %p1278_p2, %p57_p6 }
  0x4a   : > { %p59_p5 = por %p58_p10, %p57_p6  ;;  %s47_s21 = ssub.s32 %s1174_s11, %s1575_s25 }
  0x4b   : > { %s1560_s27 = scalar_select %p1373_p7, 1, 0 }
  0x4c   : > { %s320_s28 = sand.u32 1, %s1166_s9   ;;  %p48_p9 = scmp.eq.s32.totalorder %s47_s21, 0 }
  0x4d   : > { %s823_s23 = sshll.u32 %s320_s28, 2  ;;  %s824_s6 = sshll.u32 %s1174_s11, 6 }
  0x4e   : > { %s1382_s13 = scalar_select %p48_p9, %s1166_s9, %s50_s26  }
  0x4f   : > { %s1387_s29 = scalar_lea.hbm %s1537_s0, %s824_s6  ;;  %s324_s15 = scalar_lea.vmem [#allocation6], %s823_s23 }
  0x50   : > { %s331_s17 = sshll.u32 %s324_s15, 4  ;;  %p1391_p2 = pnand %p893_p3, %p59_p5  ;;  %s1395_s17 = int_to_ptr.vmem [resolvable:$true] %s331_s17 }
  0x51   : > { %s321_s24 = scalar_lea.sflag [#allocation7], %s320_s28  ;;  %s1030_s26 = scalar_lea.hbm %s1387_s29, 64 }
  0x52   : > { %p1031_p11 = scmp.ne.s32.totalorder %s1387_s29, %s1030_s26  ;;  %p1032_p12 = pneg %p1391_p2 }
  0x53   : > { %s1035_s6 = scalar_lea.hbm %s1537_s0, 128  ;;  %p1036_p4 = scmp.lt.u32.totalorder %s1387_s29, %s1537_s0 }
  0x54   : > { %p1033_p0 = pnand %p1032_p12, %p1031_p11  ;;  %p1037_p13 = scmp.lt.u32.totalorder %s1035_s6, %s1030_s26 }
  0x55   : > { %p1039_p10 = scmp.lt.u32.totalorder %s1030_s26, %s1387_s29 }
  0x56   : > { %p1034_p1 = pneg %p1033_p0  ;;  %p1038_p6 = por %p1037_p13, %p1036_p4 }
  0x58   : > { %p1040_p3 = por %p1039_p10, %p1038_p6 }
  0x5a   : > { %p1041_p5 = pnand %p1040_p3, %p1034_p1 }
  0x5c   : > { %1044 = shalt.err (!%p1041_p5)
}
  0x5d   : > { %s1045_s28 = scalar_lea.vmem %s1395_s17, 64  ;;  %s1186_s15 = smov [#allocation6]  }
  0x5e   : > { %p1046_p9 = scmp.ne.s32.totalorder %s1395_s17, %s1045_s28  ;;  %s1050_s21 = sshll.u32 %s1186_s15, 4  ;;  %s1051_s21 = int_to_ptr.vmem [resolvable:$false] %s1050_s21 }
  0x5f   : > { %s1052_s23 = scalar_lea.vmem %s1051_s21, 128  ;;  %p1053_p7 = scmp.lt.s32.totalorder %s1395_s17, %s1051_s21 }
  0x60   : > { %p1048_p11 = pnand %p1046_p9, %p1032_p12  ;;  %p1054_p4 = scmp.lt.s32.totalorder %s1052_s23, %s1045_s28 }
  0x62   : > { %p1049_p0 = pneg %p1048_p11  ;;  %p1055_p13 = por %p1054_p4, %p1053_p7 }
  0x64   : > { %p1056_p6 = pnand %p1055_p13, %p1049_p0 }
  0x66   : > { %1059 = shalt.err (!%p1056_p6)
}
  0x67   : > { %883 = dma.hbm_to_vmem [thread:$0]  (!%p1391_p2), %s1387_s29, 64, %s1395_s17, %s321_s24  }
  0x68   : > { %340 = sbr.rel (%p1294_p8) target bundleno = 672 (0x2a0), region = 48  ;;  %s1425_s26 = sand.u32 (!%p1294_p8), 1, %s1162_s30  }
  0x69   : > { %s826_s6 = sshll.u32 (!%p1294_p8), %s1425_s26, 2  ;;  %s343_s19 = scalar_lea.sflag (!%p1294_p8), [#allocation7], %s1425_s26 }
  0x6a   : > { %s346_s20 = scalar_lea.vmem (!%p1294_p8), [#allocation6], %s826_s6  ;;  %p1562_p7 = scmp.ne.s32.totalorder (!%p1294_p8), %s1555_s16, 0 }
  0x6f   : > { %1141 = dma.done.wait (%p1562_p7), %s343_s19, 64  }
  0x70   : > { %1143 = vsyncadd (%p1562_p7), %s343_s19, 4294967232  ;;  %p1563_p12 = scmp.ne.s32.totalorder %s1553_s14, 0 }
  0x72   : > { %1145 = dma.done.wait (%p1563_p12), [#allocation10], 768  }
  0x73   : > { %1147 = vsyncadd (%p1563_p12), [#allocation10], 4294966528  ;;  %v1187_v1 = vmov 0.0   ;;  %vm1188_vm0 = vmmov 0   ;;  %v1189_v2 = vmov 0   ;;  %v956_v3 = vld [vmem:[#allocation9] sm:$0xff]   ;;  %v410_v10 = vlaneseq }
  0x74   : > { %851 = vmatprep.subr.bf16.mxu1 %v1187_v1  ;;  %855 = vmatprep.mubr.msk.bf16.mxu1 %vm1188_vm0, %v1187_v1  ;;  %v957_v4 = vld [vmem:[#allocation9 + $0x8] sm:$0xff]   ;;  %v958_v5 = vld [vmem:[#allocation11 + $0x4] ss:$8 sps:$4 sm:$0xff]   ;;  %v960_v6 = vld [vmem:[#allocation11] ss:$8 sps:$4 sm:$0xff]   ;;  %vm440_vm1 = vcmask 261120  }
  0x75   : > { %476 = vmatprep.mubr.bf16.mxu0 %v1189_v2  ;;  %955 = vset.pattern.permute.xlu1 %v1189_v2  ;;  %v961_v7 = vld [vmem:[#allocation11 + $0x14] ss:$8 sps:$4 sm:$0xff]   ;;  %v399_v8 = vld [vmem:[%s346_s20] sm:$0xf]  ;;  %v963_v9 = vld [vmem:[#allocation11 + $0x10] ss:$8 sps:$4 sm:$0xff]  }
  0x76   : > { %954 = vset.pattern.permute.xlu0 %v1189_v2  ;;  %852 = vmatpush3.bf16.msra.mxu1 %v956_v3  ;;  %v411_v11 = vshrl.u32 %v410_v10, 7  ;;  %v408_v13 = vld [vmem:[%s1541_s4] sm:$0x3]  ;;  %s829_s18 = sshll.u32 %s1425_s26, 3  ;;  %s844_s15 = sshll.u32 %s1170_s10, 7 }
  0x77   : > { %853 = vmatprep.subr.bf16.mxu1 %v1187_v1  ;;  %444 = vmatprep.subr.bf16.mxu0 %v958_v5  ;;  %v838_v16 = vld [vmem:[%s1539_s2] ss:$0 sm:$0xff]  ;;  %s1447_s22 = scalar_lea.vmem [#allocation12], %s829_s18  ;;  %s1460_s19 = scalar_lea.hbm %s1544_s7, %s844_s15 }
  0x78   : > { %445 = vmatpush1.bf16.msra.mxu0 %v960_v6  ;;  %v416_v12 = vsub.s32 1, %v411_v11  ;;  %v412_v15 = vsub.s32 0, %v411_v11  ;;  %v836_v28 = vld [vmem:[%s1542_s5] ss:$0 sm:$0xff]  ;;  %s659_s21 = sshll.u32 %s1447_s22, 4  ;;  %s640_s20 = scalar_lea.sflag [#allocation8], %s1425_s26  ;;  %s660_s21 = int_to_ptr.vmem [resolvable:$true] %s659_s21 }
  0x79   : > { %446 = vmatprep.subr.bf16.mxu0 %v961_v7  ;;  %v837_v39 = vld [vmem:[#allocation5] ss:$0 sm:$0xff]  ;;  %s1060_s14 = scalar_lea.vmem %s660_s21, 128  ;;  %p1564_p2 = scmp.ne.s32.totalorder %s1560_s27, 0 }
  0x7a   : > { %854 = vmatpush3.bf16.msra.mxu1 %v957_v4  ;;  %v417_v14 = vrot.slane %v408_v13, %v416_v12  ;;  %v413_v20 = vrot.slane %v408_v13, %v412_v15  ;;  %p1061_p8 = scmp.ne.s32.totalorder %s660_s21, %s1060_s14  ;;  %s1190_s16 = smov [#allocation12]  }
  0x7b   : > { %s1064_s29 = sshll.u32 %s1190_s16, 4  ;;  %s1065_s29 = int_to_ptr.vmem [resolvable:$false] %s1064_s29 }
  0x7c   : > { %447 = vmatpush1.bf16.msra.mxu0 %v963_v9  ;;  %p1062_p1 = pnand %p1061_p8, %p1564_p2  ;;  %s1066_s17 = scalar_lea.vmem %s1065_s29, 256 }
  0x7d   : > { %856 = vmatmul.mubr.msk.bf16.vlgmr.msra.gmra.mrb[0].mxu1 %vm440_vm1, %v399_v8  ;;  %p1067_p3 = scmp.lt.s32.totalorder %s660_s21, %s1065_s29  ;;  %p1068_p5 = scmp.lt.s32.totalorder %s1066_s17, %s1060_s14 }
  0x7e   : > { %p1063_p10 = pneg %p1062_p1 }
  0x7f   : > { %835 = vmatmul.mubr.msk.bf16.vlgmr.msra.gmra.mrb[0].mxu0 %vm440_vm1, %v399_v8  ;;  %p1069_p9 = por %p1068_p5, %p1067_p3 }
  0x81   : > { %p1070_p11 = pnand %p1069_p9, %p1063_p10 }
 0x150   : > { %v585_v17 = vpop.f32.mrb[0].mxu1 }
 0x151   : > { %v586_v18 = vadd.f32 %v838_v16, %v585_v17  ;;  %v857_v19 = vpop.f32.mrb[1].mxu1 }
 0x152   : > { %v588_v21 = vpop.f32.mrb[2].mxu1  ;;  %v478_v23 = vpop.f32.mrb[0].mxu0 }
 0x153   : > { %614 = vmax.xlane.f32.xlu0 %v586_v18  ;;  %v858_v22 = vpop.f32.mrb[3].mxu1  ;;  %591 = vst [vmem:[%s1447_s22] sm:$0xff] %v586_v18  ;;  %v479_v24 = vadd.f32 %v478_v23, %v413_v20  ;;  %v480_v25 = vpop.f32.mrb[1].mxu0  ;;  %v594_v32 = vsub.f32 -inf, %v586_v18  ;;  %v601_v34 = vsub.f32 %v586_v18, %v586_v18 }
 0x154   : > { %v481_v26 = vadd.f32 %v480_v25, %v417_v14  ;;  %v482_v27 = vpop.f32.mrb[2].mxu0 }
 0x155   : > { %v485_v29 = vmax.f32 %v479_v24, 0.0  ;;  %v483_v30 = vpop.f32.mrb[3].mxu0  ;;  %v595_v33 = vmul.f32 1.442695, %v594_v32  ;;  %v602_v35 = vmul.f32 1.442695, %v601_v34 }
 0x157   : > { %v493_v31 = vmul.f32 %v836_v28, %v485_v29  ;;  %964 = vpow2.f32 %v595_v33 }
 0x158   : > { %966 = vpow2.f32 %v602_v35 }
 0x159   : > { %494 = vadd.xlane.f32.xlu0 %v493_v31 }
 0x161   : > { %v965_v40 = vpop.eup %964 }
 0x162   : > { %v598_v43 = vmul.f32 0.0, %v965_v40  ;;  %v967_v44 = vpop.eup %966 }
 0x163   : > { %v605_v46 = vmul.f32 %v967_v44, %v586_v18 }
 0x164   : > { %v604_v45 = vadd.f32 %v967_v44, %v598_v43 }
 0x165   : > { %v606_v49 = vadd.f32 %v605_v46, %v598_v43 }
 0x1e0   : > { %v615_v36 = vpop.xlane.xlu0 %614 }
 0x1e1   : > { %v616_v37 = vsub.f32 %v586_v18, %v615_v36 }
 0x1e3   : > { %v617_v38 = vmul.f32 1.442695, %v616_v37 }
 0x1e5   : > { %968 = vpow2.f32 %v617_v38 }
 0x1e6   : > { %v495_v41 = vpop.xlane.xlu0 %494 }
 0x1e7   : > { %v503_v42 = vadd.f32 %v837_v39, %v495_v41 }
 0x1e9   : > { %510 = vperm.xlu0 %954, %v503_v42  }
 0x1ef   : > { %v969_v47 = vpop.eup %968 }
 0x1f0   : > { %v620_v48 = vmul.f32 %v969_v47, %v604_v45  ;;  %v624_v50 = vmul.f32 %v969_v47, %v606_v49 }
 0x1f2   : > { %621 = vadd.xlane.f32.xlu1 %v620_v48 }
 0x1f6   : > { %625 = vadd.xlane.f32.xlu1 %v624_v50 }
 0x207   : > { %516 = vperm.xlu1 %955, %v481_v26  }
 0x208   : > { %1073 = shalt.err (!%p1070_p11)
}
 0x209   : > { %s1074_s22 = scalar_lea.hbm %s1460_s19, 128  ;;  %s1078_s23 = scalar_lea.hbm %s1544_s7, 256 }
 0x20a   : > { %p1075_p0 = scmp.ne.s32.totalorder %s1460_s19, %s1074_s22  ;;  %p1079_p6 = scmp.lt.u32.totalorder %s1460_s19, %s1544_s7 }
 0x20b   : > { %p1080_p7 = scmp.lt.u32.totalorder %s1078_s23, %s1074_s22  ;;  %p1082_p8 = scmp.lt.u32.totalorder %s1074_s22, %s1460_s19 }
 0x20c   : > { %p1076_p4 = pnand %p1075_p0, %p1564_p2 }
 0x20d   : > { %p1081_p12 = por %p1080_p7, %p1079_p6 }
 0x20e   : > { %p1077_p13 = pneg %p1076_p4 }
 0x20f   : > { %p1083_p1 = por %p1082_p8, %p1081_p12 }
 0x211   : > { %p1084_p10 = pnand %p1083_p1, %p1077_p13 }
 0x213   : > { %1087 = shalt.err (!%p1084_p10)
}
 0x214   : > { %869 = dma.vmem_to_hbm [thread:$0]  (%p1564_p2), %s660_s21, 128, %s1460_s19, %s640_s20   ;;  %v505_v52 = vand.u32 127, %v410_v10 }
 0x215   : > { %s394_s21 = scalar_lea.vmem [#allocation13], %s829_s18  ;;  %s1488_s29 = scalar_lea.hbm %s1545_s8, %s844_s15 }
 0x216   : > { %vm507_vm2 = vcmp.eq.s32.totalorder %v505_v52, 1  ;;  %vm506_vm3 = vcmp.eq.s32.totalorder %v505_v52, 0  ;;  %s672_s19 = sshll.u32 %s394_s21, 4  ;;  %vm635_vm4 = vcmp.eq.s32.totalorder %v505_v52, 2  ;;  %s645_s17 = scalar_lea.sflag [#allocation14], %s1425_s26  ;;  %s1490_s19 = int_to_ptr.vmem [resolvable:$true] %s672_s19 }
 0x217   : > { %s1088_s22 = scalar_lea.vmem %s1490_s19, 128  ;;  %s1191_s18 = smov [#allocation13]  }
 0x218   : > { %p1089_p3 = scmp.ne.s32.totalorder %s1490_s19, %s1088_s22  ;;  %s1092_s10 = sshll.u32 %s1191_s18, 4  ;;  %s1093_s10 = int_to_ptr.vmem [resolvable:$false] %s1092_s10 }
 0x219   : > { %s1094_s24 = scalar_lea.vmem %s1093_s10, 256  ;;  %p1095_p11 = scmp.lt.s32.totalorder %s1490_s19, %s1093_s10 }
 0x21a   : > { %p1090_p5 = pnand %p1089_p3, %p1564_p2  ;;  %p1096_p0 = scmp.lt.s32.totalorder %s1094_s24, %s1088_s22 }
 0x21c   : > { %p1091_p9 = pneg %p1090_p5  ;;  %p1097_p4 = por %p1096_p0, %p1095_p11 }
 0x21e   : > { %p1098_p13 = pnand %p1097_p4, %p1091_p9 }
 0x268   : > { %v511_v55 = vpop.permute.xlu0 %510 }
 0x269   : > { %v513_v60 = vsel %vm507_vm2, %v511_v55, 0.0 }
 0x27f   : > { %v622_v51 = vpop.xlane.xlu1 %621 }
 0x280   : > { %970 = vlog2.f32 %v622_v51 }
 0x281   : > { %972 = vrcp.f32 %v622_v51 }
 0x283   : > { %v626_v53 = vpop.xlane.xlu1 %625 }
 0x287   : > { %v517_v61 = vpop.permute.xlu1 %516 }
 0x288   : > { %v519_v63 = vsel %vm506_vm3, %v517_v61, %v513_v60 }
 0x28a   : > { %v971_v54 = vpop.eup %970 }
 0x28b   : > { %v973_v56 = vpop.eup %972  ;;  %v628_v57 = vmul.f32 0.6931472, %v971_v54 }
 0x28c   : > { %v631_v59 = vmul.f32 %v973_v56, %v626_v53 }
 0x28d   : > { %v629_v58 = vadd.f32 %v628_v57, %v615_v36 }
 0x28f   : > { %v632_v62 = vsub.f32 %v629_v58, %v631_v59 }
 0x291   : > { %v637_v0 = vsel %vm635_vm4, %v632_v62, %v519_v63 }
 0x292   : > { %638 = vst [vmem:[%s394_s21] sm:$0xff] %v637_v0 }
 0x293   : > { %1101 = shalt.err (!%p1098_p13)
}
 0x294   : > { %s1102_s26 = scalar_lea.hbm %s1488_s29, 128  ;;  %s1106_s23 = scalar_lea.hbm %s1545_s8, 256 }
 0x295   : > { %p1103_p6 = scmp.ne.s32.totalorder %s1488_s29, %s1102_s26  ;;  %p1107_p8 = scmp.lt.u32.totalorder %s1488_s29, %s1545_s8 }
 0x296   : > { %p1108_p1 = scmp.lt.u32.totalorder %s1106_s23, %s1102_s26  ;;  %p1110_p3 = scmp.lt.u32.totalorder %s1102_s26, %s1488_s29 }
 0x297   : > { %p1104_p7 = pnand %p1103_p6, %p1564_p2 }
 0x298   : > { %p1109_p10 = por %p1108_p1, %p1107_p8 }
 0x299   : > { %p1105_p12 = pneg %p1104_p7 }
 0x29a   : > { %p1111_p5 = por %p1110_p3, %p1109_p10 }
 0x29c   : > { %p1112_p9 = pnand %p1111_p5, %p1105_p12 }
 0x29e   : > { %1115 = shalt.err (!%p1112_p9)
}
 0x29f   : > { %870 = dma.vmem_to_hbm [thread:$0]  (%p1564_p2), %s1490_s19, 128, %s1488_s29, %s645_s17  }
 0x2a0 PF: > { %s1565_s21 = sld [smem:[#allocation19_spill]]  ;;  %s1566_s20 = sld [smem:[#allocation20_spill]] }
 0x2a1   : > { %p1568_p0 = scmp.ge.s32.totalorder %s1178_s12, 2 }
 0x2a6   : > { %s684_s14 = sand.u32 1, %s1565_s21   ;;  %p1567_p11 = scmp.ne.s32.totalorder %s1566_s20, 0 }
 0x2a7   : > { %s685_s22 = scalar_lea.sflag [#allocation8], %s684_s14 }
 0x2a8   : > { %p885_p4 = pnand %p1568_p0, %p1567_p11 }
 0x2aa   : > { %1149 = dma.done.wait (!%p885_p4), %s685_s22, 128  }
 0x2ab   : > { %1151 = vsyncadd (!%p885_p4), %s685_s22, 4294967168  ;;  %s694_s18 = scalar_lea.sflag [#allocation14], %s684_s14 }
 0x2ac   : > { %1153 = dma.done.wait (!%p885_p4), %s694_s18, 128  }
 0x2ad   : > { %1155 = vsyncadd (!%p885_p4), %s694_s18, 4294967168  ;;  %s31_s12 = sadd.s32 1, %s1178_s12   ;;  %s1569_s29 = smov %s1162_s30 }
 0x2ae   : > { %p28_p13 = scmp.ge.s32.totalorder %s31_s12, 4   ;;  %s1570_s30 = smov %s1166_s9 }
 0x2af   : > { %s1571_s9 = smov %s1382_s13  ;;  %s1572_s10 = smov %s1174_s11 }
 0x2b0   : > { %s1573_s11 = smov %s1575_s25  ;;  %30 = sbr.rel (!%p28_p13) target bundleno = 12 (0xc), region = 130 }
 0x2b7   :  { %699 = vsyncpa [#allocation7], 1 }
 0x2b8   :  { %701 = vsyncpa [#allocation7 + $0x1], 1 }
 0x2b9   :  { %702 = vsyncpa [#allocation10], 1 }
 0x2ba   :  { %703 = vsyncpa [#allocation8], 1 }
 0x2bb   :  { %705 = vsyncpa [#allocation8 + $0x1], 1 }
 0x2bc   :  { %706 = vsyncpa [#allocation14], 1 }
 0x2bd   :  { %708 = vsyncpa [#allocation14 + $0x1], 1 }

</bundles_post_ra>
